<compile_context>
chip_gen: v7x
topology: tpu7x:2x2x1
jax: 0.10.0
libtpu: 0.0.40
codegen_flags: <defaults>
</compile_context>

<pallas_src>
import math
import numpy as np

import jax
import jax.numpy as jnp
from jax.experimental import pallas as pl
from jax.experimental.pallas import tpu as pltpu


# ---------------------------------------------------------------------------
# DCT filter construction (parameter setup, plain numpy/JAX glue)
# ---------------------------------------------------------------------------
def _build_filter(pos, freq, POS):
    result = math.cos(math.pi * freq * (pos + 0.5) / POS) / math.sqrt(POS)
    if freq == 0:
        return result
    return result * math.sqrt(2)


def get_dct_filter(tile_size_x, tile_size_y, mapper_x, mapper_y, channel):
    assert len(mapper_x) == len(mapper_y)
    assert channel % len(mapper_x) == 0
    dct_filter = np.zeros((channel, tile_size_x, tile_size_y), dtype=np.float32)
    c_part = channel // len(mapper_x)
    for i, (u_x, v_y) in enumerate(zip(mapper_x, mapper_y)):
        for t_x in range(tile_size_x):
            for t_y in range(tile_size_y):
                dct_filter[i * c_part:(i + 1) * c_part, t_x, t_y] = (
                    _build_filter(t_x, u_x, tile_size_x)
                    * _build_filter(t_y, v_y, tile_size_y)
                )
    return jnp.asarray(dct_filter)


# ---------------------------------------------------------------------------
# Pallas kernel: elementwise multiply + lane-axis (spatial) reduction
# ---------------------------------------------------------------------------
def dct_kernel(x_ref, w_ref, o_ref):
    # x_ref: (TB, TC, HW)  batch x channel tile of the input
    # w_ref: (TC, HW)      matching DCT-filter tile (constant across inner axis)
    # o_ref: (TB, TC)      disjoint, lane-dense per-step output block
    x = x_ref[...].astype(jnp.float32)            # f32 accumulation (bf16-safe)
    w = w_ref[...].astype(jnp.float32)
    prod = x * w                                  # VPU elementwise (w broadcasts over TB)
    o_ref[...] = jnp.sum(prod, axis=-1).astype(o_ref.dtype)   # XLU lane reduce


# ---------------------------------------------------------------------------
# Generation-aware VMEM budget & tile chooser
# ---------------------------------------------------------------------------
def _vmem_limits():
    """Returns (vmem_limit_bytes, is_v7x_class)."""
    try:
        cap = int(pltpu.get_tpu_info().vmem_capacity_bytes)
    except Exception:
        cap = 128 << 20          # assume v5e/v6e-class if query unavailable
    if cap <= (64 << 20):        # v7x: 64 MiB physical per TC -> tighter cap
        return 32 << 20, True
    return 64 << 20, False       # v5e/v6e: 128 MiB physical -> larger blocks OK


def _choose_tiles(N, C, HW, x_isz, w_isz, o_isz, vmem_budget,
                  x_buffers=2, min_steps=4, target_block=2 << 20):
    """Pick (TB, TC) so x blocks are multi-MiB, everything fits VMEM, the
    output block is lane-dense/sublane-aligned, and (when the problem is big
    enough) there are >= min_steps grid steps for megacore sharding."""
    sub = {4: 8, 2: 16, 1: 32}.get(x_isz, 8)   # sublane packing per dtype
    # TC: full C, or a multiple of 128 (lane-dense output + (8,128)-legal).
    tc_cands = [d for d in range(1, C + 1) if C % d == 0 and (d == C or d % 128 == 0)]
    # TB: full N, or a multiple of the sublane packing.
    tb_cands = [d for d in range(1, N + 1) if N % d == 0 and (d == N or d % sub == 0)]

    def vmem_use(tb, tc):
        return (x_buffers * tb * tc * HW * x_isz   # pipelined x blocks
                + 2 * tc * HW * w_isz              # double-buffered weight tile
                + 2 * tb * tc * o_isz)             # output blocks

    max_steps = (C // min(tc_cands)) * (N // min(tb_cands))
    want_steps = min(min_steps, max_steps)

    best, best_key = None, None
    for tc in tc_cands:
        for tb in tb_cands:
            xb = tb * tc * HW * x_isz
            steps = (C // tc) * (N // tb)
            key = (
                vmem_use(tb, tc) <= vmem_budget,   # 1) fits the VMEM budget
                steps >= want_steps,               # 2) enough steps for both TCs
                -abs(xb - target_block),           # 3) x block near ~2 MiB sweet spot
            )
            if best_key is None or key > best_key:
                best, best_key = (tb, tc), key
    return best


# ---------------------------------------------------------------------------
# Wrapper
# ---------------------------------------------------------------------------
def multi_spectral_dct(x, weight, *, batch_tile=None, channel_tile=None):
    """x: (N, C, H, W), weight: (C, H, W) -> (N, C); matches torch.sum(x*w, dim=[2,3])."""
    N, C, H, W = x.shape
    assert weight.shape == (C, H, W)
    HW = H * W

    # Flatten spatial dims only (layout reshape); NO padding copy of x in HBM.
    x_flat = x.reshape(N, C, HW)
    w_flat = weight.reshape(C, HW)

    x_isz = jnp.dtype(x.dtype).itemsize
    w_isz = jnp.dtype(weight.dtype).itemsize
    out_dtype = x.dtype
    o_isz = jnp.dtype(out_dtype).itemsize

    vmem_limit, is_v7x = _vmem_limits()
    vmem_budget = int(0.75 * vmem_limit)   # leave headroom for compiler scratch

    TB, TC = _choose_tiles(N, C, HW, x_isz, w_isz, o_isz, vmem_budget)
    if batch_tile is not None:
        TB = batch_tile
    if channel_tile is not None:
        TC = channel_tile
    assert N % TB == 0 and C % TC == 0

    # Channel tiles outer, batch tiles inner: weight block index is constant
    # across the inner loop, so the filter tile is fetched once per C-tile.
    grid = (C // TC, N // TB)

    # Deeper x pipelining on v7x (faster HBM => fixed per-step DMA latency is
    # a larger fraction of wall time) -- only if it still fits the budget.
    x_buffers = 2
    if is_v7x:
        need3 = 3 * TB * TC * HW * x_isz + 2 * TC * HW * w_isz + 2 * TB * TC * o_isz
        if need3 <= vmem_budget:
            x_buffers = 3
    x_spec_kwargs = {}
    if x_buffers != 2:
        x_spec_kwargs["pipeline_mode"] = pl.Buffered(x_buffers)

    return pl.pallas_call(
        dct_kernel,
        out_shape=jax.ShapeDtypeStruct((N, C), out_dtype),
        grid=grid,
        in_specs=[
            # x: (TB, TC, HW) block; last dim is the FULL flattened spatial dim
            # (no HBM pad needed; Mosaic masks the lane tail in VMEM).
            pl.BlockSpec((TB, TC, HW), lambda c, b: (b, c, 0), **x_spec_kwargs),
            # weight: (TC, HW) tile, invariant across the inner batch axis.
            pl.BlockSpec((TC, HW), lambda c, b: (c, 0)),
        ],
        # Disjoint lane-dense (TB, TC) output blocks -> unmasked dense stores,
        # pipelined writeback, both grid axes safe to mark "parallel".
        out_specs=pl.BlockSpec((TB, TC), lambda c, b: (b, c)),
        compiler_params=pltpu.CompilerParams(
            dimension_semantics=("parallel", "parallel"),
            vmem_limit_bytes=vmem_limit,
        ),
    )(x_flat, w_flat)


# ---------------------------------------------------------------------------
# Main
# ---------------------------------------------------------------------------
if __name__ == "__main__":
    # Small shapes consistent with the module:
    #   batch=2, channel=4, spatial 16x16, num_freq=2 (channel % num_freq == 0)
    N, C, H, W = 2, 4, 16, 16
    mapper_x = [0, 1]
    mapper_y = [0, 1]

    weight = get_dct_filter(H, W, mapper_x, mapper_y, C)   # (C, H, W), float32

    key = jax.random.PRNGKey(0)
    x = jax.random.normal(key, (N, C, H, W), dtype=jnp.float32)

    out = multi_spectral_dct(x, weight)
    out = jax.block_until_ready(out)

    # Reference check (pure JAX) to validate kernel semantics.
    ref = jnp.sum(x * weight[None, ...], axis=(2, 3))
    assert out.shape == (N, C)
    np.testing.assert_allclose(np.asarray(out), np.asarray(ref),
                               rtol=1e-5, atol=1e-5)

    print("KERNEL_OK")
</pallas_src>

<mosaic_0001>
module attributes {stable_mosaic.version = 11 : i64} {
  func.func @dct_kernel(%arg0: i32, %arg1: i32, %arg2: memref<2x4x256xf32, #tpu.memory_space<vmem>>, %arg3: memref<4x256xf32, #tpu.memory_space<vmem>>, %arg4: memref<2x4xf32, #tpu.memory_space<vmem>>) attributes {dimension_semantics = [#tpu.dimension_semantics<parallel>, #tpu.dimension_semantics<parallel>], iteration_bounds = array<i64: 1, 1>, scalar_prefetch = 0 : i64, scratch_operands = 0 : i64, tpu.core_type = #tpu.core_type<tc>, window_params = [{transform_indices = @transform_0, window_bounds = array<i64: 2, 4, 256>}, {transform_indices = @transform_1, window_bounds = array<i64: 4, 256>}, {transform_indices = @transform_2, window_bounds = array<i64: 2, 4>}]} {
    %c0 = arith.constant 0 : index
    %c0_0 = arith.constant 0 : index
    %c0_1 = arith.constant 0 : index
    %0 = vector.load %arg2[%c0, %c0_0, %c0_1] : memref<2x4x256xf32, #tpu.memory_space<vmem>>, vector<2x4x256xf32>
    %c0_2 = arith.constant 0 : index
    %c0_3 = arith.constant 0 : index
    %1 = vector.load %arg3[%c0_2, %c0_3] : memref<4x256xf32, #tpu.memory_space<vmem>>, vector<4x256xf32>
    %2 = vector.shape_cast %1 : vector<4x256xf32> to vector<1x4x256xf32>
    %3 = vector.broadcast %2 : vector<1x4x256xf32> to vector<2x4x256xf32>
    %4 = arith.mulf %0, %3 : vector<2x4x256xf32>
    %cst = arith.constant dense<0.000000e+00> : vector<2x4xf32>
    %5 = vector.multi_reduction <add>, %4, %cst [2] : vector<2x4x256xf32> to vector<2x4xf32>
    %c0_4 = arith.constant 0 : index
    %c0_5 = arith.constant 0 : index
    %6 = vector.load %arg4[%c0_4, %c0_5] : memref<2x4xf32, #tpu.memory_space<vmem>>, vector<2x4xf32>
    tpu.vector_store %arg4[%c0_4, %c0_5], %5 {strides = array<i32>} : memref<2x4xf32, #tpu.memory_space<vmem>>, vector<2x4xf32>,
    return
  }
  func.func @transform_0(%arg0: i32, %arg1: i32) -> (i32, i32, i32) {
    %c0_i32 = arith.constant 0 : i32
    %c0_i32_0 = arith.constant 0 : i32
    return %arg1, %arg0, %c0_i32 : i32, i32, i32
  }
  func.func @transform_1(%arg0: i32, %arg1: i32) -> (i32, i32) {
    %c0_i32 = arith.constant 0 : i32
    %c0_i32_0 = arith.constant 0 : i32
    return %arg0, %c0_i32 : i32, i32
  }
  func.func @transform_2(%arg0: i32, %arg1: i32) -> (i32, i32) {
    %c0_i32 = arith.constant 0 : i32
    return %arg1, %arg0 : i32, i32
  }
}

</mosaic_0001>

<bundles_post_ra>
// kernel: tpu_custom_call.1
= control target key start
LH: loop header
LB: loop body
LE: loop exit
PB: predicated region body
PF: predicated region fallthrough
CT: control target
= control target key end

     0   :  { %7 = vsyncpa [#allocation3], 0  ;;  %s226_s0 = inlined_call_operand.hbm [shape: f32[2,4,256], index: 0, kind: input, shape index: {}]   ;;  %s227_s1 = inlined_call_operand.hbm [shape: f32[4,256], index: 1, kind: input, shape index: {}]   ;;  %s228_s2 = inlined_call_operand.hbm [shape: f32[2,4], index: 2, kind: output, shape index: {}]  }
   0x1   :  { %8 = vsyncpa [#allocation6], 0 }
   0x2   :  { %9 = vsyncpa [#allocation4], 0  ;;  %s170_s9 = smov [#allocation2]   ;;  %s98_s13 = scalar_lea.hbm %s226_s0, 256 }
   0x3   :  { %s15_s10 = sshll.u32 %s170_s9, 4  ;;  %p99_p0 = scmp.ne.s32.totalorder %s226_s0, %s98_s13  ;;  %s16_s10 = int_to_ptr.vmem [resolvable:$true] %s15_s10 }
   0x4   :  { %p102_p1 = scmp.lt.u32.totalorder %s98_s13, %s226_s0 }
   0x6   :  { %p104_p2 = pnand %p102_p1, %p99_p0 }
   0x8   :  { %107 = shalt.err (!%p104_p2)
}
   0x9   :  { %s108_s18 = scalar_lea.vmem %s16_s10, 256  ;;  %p113_p4 = scmp.lt.s32.totalorder %s16_s10, %s16_s10 }
   0xa   :  { %p109_p3 = scmp.ne.s32.totalorder %s16_s10, %s108_s18  ;;  %p114_p5 = scmp.lt.s32.totalorder %s108_s18, %s108_s18 }
   0xc   :  { %p115_p6 = por %p114_p5, %p113_p4 }
   0xe   :  { %p116_p7 = pnand %p115_p6, %p109_p3 }
  0x10   :  { %119 = shalt.err (!%p116_p7)
}
  0x11   :  { %s171_s19 = smov 128   ;;  %s172_s20 = smov 8  }
  0x12   :  { %21 = dma.hbm_to_vmem [thread:$0]  %s226_s0, 256, %s16_s10, [#allocation3], %s171_s19, %s171_s19, %s172_s20  }
  0x13   :  { %s173_s23 = smov [#allocation5]   ;;  %s120_s27 = scalar_lea.hbm %s227_s1, 128 }
  0x14   :  { %s28_s24 = sshll.u32 %s173_s23, 4  ;;  %p121_p8 = scmp.ne.s32.totalorder %s227_s1, %s120_s27  ;;  %s29_s24 = int_to_ptr.vmem [resolvable:$true] %s28_s24 }
  0x15   :  { %p124_p9 = scmp.lt.u32.totalorder %s120_s27, %s227_s1 }
  0x17   :  { %p126_p10 = pnand %p124_p9, %p121_p8 }
  0x19   :  { %129 = shalt.err (!%p126_p10)
}
  0x1a   :  { %s130_s4 = scalar_lea.vmem %s29_s24, 128  ;;  %p135_p12 = scmp.lt.s32.totalorder %s29_s24, %s29_s24 }
  0x1b   :  { %p131_p11 = scmp.ne.s32.totalorder %s29_s24, %s130_s4  ;;  %p136_p13 = scmp.lt.s32.totalorder %s130_s4, %s130_s4 }
  0x1d   :  { %p137_p0 = por %p136_p13, %p135_p12 }
  0x1f   :  { %p138_p1 = pnand %p137_p0, %p131_p11 }
  0x21   :  { %141 = shalt.err (!%p138_p1)
}
  0x22   :  { %31 = dma.hbm_to_vmem [thread:$0]  %s227_s1, 128, %s29_s24, [#allocation6]  }
  0x23   :  { %164 = dma.done.wait [#allocation3], 256  }
  0x24   :  { %165 = vsyncadd [#allocation3], 4294967040 }
  0x25   :  { %166 = dma.done.wait [#allocation6], 128  }
  0x26   :  { %167 = vsyncadd [#allocation6], 4294967168  ;;  %v38_v0 = vld [vmem:[#allocation2] sm:$0xff]  ;;  %v40_v1 = vld [vmem:[#allocation5] sm:$0xff]  ;;  %vm49_vm0 = vcmask 1043456   ;;  %v62_v13 = vlaneseq  ;;  %s174_s1 = smov [#allocation7]  }
  0x27   :  { %v39_v2 = vld [vmem:[#allocation2 + $0x8] sm:$0xff]  ;;  %v41_v3 = vmul.f32 %v40_v1, %v38_v0  ;;  %s83_s6 = sshll.u32 %s174_s1, 4  ;;  %vm72_vm1 = vcmask 1041409   ;;  %vm75_vm2 = vcmask 25600   ;;  %s84_s6 = int_to_ptr.vmem [resolvable:$true] %s83_s6 }
  0x28   :  { %v42_v4 = vmul.f32 %v40_v1, %v39_v2  ;;  %v63_v14 = vand.u32 127, %v62_v13  ;;  %v65_v15 = vshrl.u32 %v62_v13, 7  ;;  %s142_s7 = scalar_lea.vmem %s84_s6, 32  ;;  %p147_p3 = scmp.lt.s32.totalorder %s84_s6, %s84_s6 }
  0x29   :  { %v45_v5 = vcombine.high %v41_v3, %v41_v3  ;;  %v50_v6 = vsel %vm49_vm0, %v41_v3, 0.0  ;;  %p143_p2 = scmp.ne.s32.totalorder %s84_s6, %s142_s7  ;;  %p148_p4 = scmp.lt.s32.totalorder %s142_s7, %s142_s7 }
  0x2a   :  { %v46_v7 = vcombine.high %v42_v4, %v42_v4  ;;  %v55_v9 = vsel %vm49_vm0, %v42_v4, 0.0  ;;  %v66_v17 = vsub.s32 %v63_v14, %v65_v15 }
  0x2b   :  { %v51_v8 = vsel %vm49_vm0, %v45_v5, 0.0  ;;  %p149_p5 = por %p148_p4, %p147_p3 }
  0x2c   :  { %v56_v10 = vsel %vm49_vm0, %v46_v7, 0.0  ;;  %v52_v11 = vadd.f32 %v51_v8, %v50_v6 }
  0x2d   :  { %v57_v12 = vadd.f32 %v56_v10, %v55_v9  ;;  %p150_p6 = pnand %p149_p5, %p143_p2 }
  0x2e   :  { %53 = vadd.xlane.f32.xlu0 %v52_v11 }
  0x32   :  { %58 = vadd.xlane.f32.xlu0 %v57_v12 }
  0xbb   :  { %v54_v16 = vpop.xlane.xlu0 %53 }
  0xbc   :  { %v67_v19 = vrot.slane %v54_v16, %v66_v17 }
  0xbf   :  { %v59_v18 = vpop.xlane.xlu0 %58 }
  0xc0   :  { %v71_v20 = vrot.slane %v59_v18, %v66_v17 }
  0xc2   :  { %v73_v21 = vsel %vm72_vm1, %v71_v20, %v67_v19 }
  0xc3   :  { %76 = vst.msk [vmem:[#allocation7] sm:$0x3] %vm75_vm2, %v73_v21 }
  0xc4   :  { %153 = shalt.err (!%p150_p6)
}
  0xc5   :  { %s154_s10 = scalar_lea.hbm %s228_s2, 32 }
  0xc6   :  { %p155_p7 = scmp.ne.s32.totalorder %s228_s2, %s154_s10  ;;  %p158_p8 = scmp.lt.u32.totalorder %s154_s10, %s228_s2 }
  0xc8   :  { %p160_p9 = pnand %p158_p8, %p155_p7 }
  0xca   :  { %163 = shalt.err (!%p160_p9)
}
  0xcb   :  { %86 = dma.vmem_to_hbm [thread:$0]  %s84_s6, 32, %s228_s2, [#allocation4]  }
  0xcc   :  { %168 = dma.done.wait [#allocation4], 32  }
  0xcd   :  { %169 = vsyncadd [#allocation4], 4294967264 }
  0xce   :  { %90 = vsyncpa [#allocation3], 1 }
  0xcf   :  { %91 = vsyncpa [#allocation6], 1 }
  0xd0   :  { %92 = vsyncpa [#allocation4], 1 }

</bundles_post_ra>
